<compile_context>
chip_gen: v7x
topology: tpu7x:2x2x1
jax: 0.10.0
libtpu: 0.0.40
codegen_flags: <defaults>
</compile_context>

<pallas_src>
import jax
import jax.numpy as jnp
from jax.experimental import pallas as pl
from jax.experimental.pallas import tpu as pltpu


# ----------------------------- model config ---------------------------------
IN_CH = 3        # ddconfig['in_channels'] / out_ch
Z_CH = 4         # ddconfig['z_channels'], double_z=True -> encoder emits 2*Z_CH
EMBED = 4        # embed_dim
RES = 16         # input resolution
BATCH = 2


def _round_up(x, m):
    return (x + m - 1) // m * m


def _pick_m_tiling(m):
    """Lane-axis (M) tiling.

    * tile is a multiple of 128 lanes -> lane-dense, unmasked stores,
    * grid >= 2 so v7x's second TensorCore gets work under ("parallel",),
    * tiles grow to 256 / 512 as M grows (v6e/v7x 256-wide MXU, HBM roofline).
    Returns (tile, padded_M).
    """
    for tm in (512, 256, 128):
        if m > tm:                       # at least two tiles
            return tm, _round_up(m, tm)
    return 128, 256                      # tiny M: pad so grid == 2 anyway


# ----------------------------- Pallas kernels -------------------------------
def _encode_fused_kernel(cols_ref, enc_w_ref, enc_b_ref, qw_ref, qb_ref,
                         pqw_ref, pqb_ref, eps_ref, e1_ref,
                         mu_ref, lv_ref, df_ref, pz_ref):
    """encoder conv matmul -> quant_conv -> Student-t reparam -> post_quant_conv.

    Channel-major layout: channels on sublanes, M (pixels) on lanes.  One M-tile
    per grid step; everything stays resident in VMEM.
    """
    ed = mu_ref.shape[0]

    # Encoder stand-in conv as (C1, K) @ (K, tm): bf16 operands, f32 MXU accumulate.
    h = (jnp.dot(enc_w_ref[...], cols_ref[...],
                 preferred_element_type=jnp.float32) + enc_b_ref[...])

    # quant_conv (1x1): ONE merged dot; torch.chunk(z_params, 3, dim=1) becomes
    # a cheap sublane-row split of the (3*EMBED, tm) result.
    q = (jnp.dot(qw_ref[...], h.astype(jnp.bfloat16),
                 preferred_element_type=jnp.float32) + qb_ref[...])
    mu = q[0:ed, :]
    logvar = q[ed:2 * ed, :]
    logdf = q[2 * ed:3 * ed, :]

    # Student-t reparameterization, exactly as TVAE.encode (all f32 on VPU/EUP):
    #   df    = clamp(exp(logdf) + 2.1, 2.1, 50.0)
    #   scale = exp(0.5 * logvar)
    #   v     = Exp(1) * (1/df)
    #   z     = mu + scale * eps * sqrt(df / v) = mu + scale * eps * df * rsqrt(Exp(1))
    df = jnp.clip(jnp.exp(logdf) + 2.1, 2.1, 50.0)
    scale = jnp.exp(0.5 * logvar)
    z = mu + scale * eps_ref[...] * df * jax.lax.rsqrt(e1_ref[...])

    # post_quant_conv (1x1) on the still-resident z (bf16 operands, f32 acc).
    pz = (jnp.dot(pqw_ref[...], z.astype(jnp.bfloat16),
                  preferred_element_type=jnp.float32) + pqb_ref[...])

    # Lane-dense channel-major outputs (no packed-slab lane slicing downstream).
    mu_ref[...] = mu
    lv_ref[...] = logvar
    df_ref[...] = df
    pz_ref[...] = pz


def _matmul_bias_kernel(w_ref, x_ref, b_ref, o_ref):
    # o = wT @ x + b   ((C_out, K) @ (K, tm): bf16 operands, f32 MXU accumulate)
    o_ref[...] = (jnp.dot(w_ref[...], x_ref[...],
                          preferred_element_type=jnp.float32) + b_ref[...])


# ----------------------------- kernel wrappers ------------------------------
def fused_encode(cols_t, eps, e1, params, tm):
    """Single pallas_call: encoder matmul -> quant -> reparam -> post_quant."""
    k1p, mp = cols_t.shape
    c1 = params["enc_w"].shape[0]
    e3 = params["quant_w"].shape[0]
    ed = e3 // 3
    zc = params["pq_w"].shape[0]
    assert mp % tm == 0 and tm % 128 == 0

    col = lambda i: (0, i)
    rep = lambda i: (0, 0)

    flops = 2 * mp * (k1p * c1 + c1 * e3 + ed * zc)
    bytes_accessed = (cols_t.size * 2 + (eps.size + e1.size) * 4
                      + mp * (3 * ed + zc) * 4
                      + (params["enc_w"].size + params["quant_w"].size
                         + params["pq_w"].size) * 2)

    return pl.pallas_call(
        _encode_fused_kernel,
        out_shape=(jax.ShapeDtypeStruct((ed, mp), jnp.float32),   # mu
                   jax.ShapeDtypeStruct((ed, mp), jnp.float32),   # logvar
                   jax.ShapeDtypeStruct((ed, mp), jnp.float32),   # df
                   jax.ShapeDtypeStruct((zc, mp), jnp.float32)),  # post_quant(z)
        grid=(mp // tm,),
        in_specs=[
            pl.BlockSpec((k1p, tm), col),   # im2col cols, (K, M) bf16
            pl.BlockSpec((c1, k1p), rep),   # enc_wT (bf16, K pre-padded)
            pl.BlockSpec((c1, 1), rep),     # enc_b
            pl.BlockSpec((e3, c1), rep),    # quant_wT (merged mu|logvar|logdf rows)
            pl.BlockSpec((e3, 1), rep),     # quant_b
            pl.BlockSpec((zc, ed), rep),    # post_quant_wT
            pl.BlockSpec((zc, 1), rep),     # post_quant_b
            pl.BlockSpec((ed, tm), col),    # eps ~ N(0,1)
            pl.BlockSpec((ed, tm), col),    # e1  ~ Exp(1)
        ],
        out_specs=(pl.BlockSpec((ed, tm), col),
                   pl.BlockSpec((ed, tm), col),
                   pl.BlockSpec((ed, tm), col),
                   pl.BlockSpec((zc, tm), col)),
        compiler_params=pltpu.CompilerParams(dimension_semantics=("parallel",)),
        cost_estimate=pl.CostEstimate(flops=flops, transcendentals=3 * ed * mp,
                                      bytes_accessed=bytes_accessed),
    )(cols_t, params["enc_w"], params["enc_b"],
      params["quant_w"], params["quant_b"],
      params["pq_w"], params["pq_b"], eps, e1)


def conv_matmul_bias_t(w_t, b, cols_t, tm):
    """M-tiled, megacore-parallel transposed conv-as-matmul: (C_out, M) = wT @ colsT."""
    c_out, k = w_t.shape
    k2, mp = cols_t.shape
    assert k == k2 and mp % tm == 0

    return pl.pallas_call(
        _matmul_bias_kernel,
        out_shape=jax.ShapeDtypeStruct((c_out, mp), jnp.float32),
        grid=(mp // tm,),
        in_specs=[pl.BlockSpec((c_out, k), lambda i: (0, 0)),
                  pl.BlockSpec((k, tm), lambda i: (0, i)),
                  pl.BlockSpec((c_out, 1), lambda i: (0, 0))],
        out_specs=pl.BlockSpec((c_out, tm), lambda i: (0, i)),
        compiler_params=pltpu.CompilerParams(dimension_semantics=("parallel",)),
        cost_estimate=pl.CostEstimate(
            flops=2 * mp * k * c_out, transcendentals=0,
            bytes_accessed=mp * k * 2 + k * c_out * 2 + mp * c_out * 4),
    )(w_t, cols_t, b)


# ----------------------------- glue (plain JAX) ------------------------------
def im2col_3x3_cm(x_cm, stride):
    """3x3, padding=1 patch extraction on channel-major input (C, N, H, W).

    Returns cols of shape (K_pad, M) with rows ordered (dh, dw, c) and M = N*Ho*Wo
    on the lane axis; K is zero-padded to a multiple of 16 (bf16 sublane pack),
    matching the pre-padded weights.

    Real PyTorch Conv2d weights (Cout, Cin, kh, kw) would be permuted to
    (kh, kw, Cin, Cout), reshaped to (9*Cin, Cout), then transposed.

    TODO(synk): for the real Encoder/Decoder fold this into the conv kernel
    (halo-tile reads, 9 shifted sub-matmuls) instead of materializing the
    9x-blown-up cols array in HBM.
    """
    c, n, h, w = x_cm.shape
    xp = jnp.pad(x_cm, ((0, 0), (0, 0), (1, 1), (1, 1)))
    ho = (h + 2 - 3) // stride + 1
    wo = (w + 2 - 3) // stride + 1
    taps = []
    for dh in range(3):
        for dw in range(3):
            taps.append(xp[:, :, dh:dh + stride * (ho - 1) + 1:stride,
                           dw:dw + stride * (wo - 1) + 1:stride])
    cols = jnp.stack(taps, axis=0).reshape(9 * c, n * ho * wo)
    kp = _round_up(9 * c, 16)
    if kp > 9 * c:
        cols = jnp.pad(cols, ((0, kp - 9 * c), (0, 0)))
    return cols, (n, ho, wo)


def _xavier(key, shape, fan_in, fan_out):
    bound = (6.0 / (fan_in + fan_out)) ** 0.5
    return jax.random.uniform(key, shape, jnp.float32, -bound, bound)


def init_params(key):
    """Weights pre-padded / pre-transposed / pre-cast ONCE here."""
    ks = jax.random.split(key, 4)
    p = {}

    # encoder stand-in: Conv2d(IN_CH, 2*Z_CH, 3, stride=2, padding=1)
    c1, k1 = 2 * Z_CH, 9 * IN_CH
    k1p = _round_up(k1, 16)
    w = _xavier(ks[0], (k1, c1), IN_CH * 9, c1 * 9)              # rows (dh, dw, cin)
    p["enc_w"] = jnp.pad(w, ((0, k1p - k1), (0, 0))).T.astype(jnp.bfloat16)  # (C1, K1p)
    p["enc_b"] = jnp.zeros((c1, 1), jnp.float32)

    # quant_conv: Conv2d(2*z_channels, 3*embed_dim, 1) — kept MERGED (one dot);
    # row order is [mu | logvar | logdf] so torch.chunk is a sublane row split.
    qw = _xavier(ks[1], (c1, 3 * EMBED), c1, 3 * EMBED)
    p["quant_w"] = qw.T.astype(jnp.bfloat16)                     # (3*EMBED, C1)
    p["quant_b"] = jnp.zeros((3 * EMBED, 1), jnp.float32)

    # post_quant_conv: Conv2d(embed_dim, z_channels, 1)
    pqw = _xavier(ks[2], (EMBED, Z_CH), EMBED, Z_CH)
    p["pq_w"] = pqw.T.astype(jnp.bfloat16)                       # (Z_CH, EMBED)
    p["pq_b"] = jnp.zeros((Z_CH, 1), jnp.float32)

    # decoder stand-in: nearest x2 upsample + Conv2d(Z_CH, IN_CH, 3, padding=1)
    k2 = 9 * Z_CH
    k2p = _round_up(k2, 16)
    w = _xavier(ks[3], (k2, IN_CH), Z_CH * 9, IN_CH * 9)
    p["dec_w"] = jnp.pad(w, ((0, k2p - k2), (0, 0))).T.astype(jnp.bfloat16)  # (IN_CH, K2p)
    p["dec_b"] = jnp.zeros((IN_CH, 1), jnp.float32)

    # LearnableStudentPrior params (used only by the KL loss, not forward()).
    p["mu_prior"] = jnp.zeros((EMBED,), jnp.float32)
    p["logvar_prior"] = jnp.zeros((EMBED,), jnp.float32)
    p["logdf_prior"] = jnp.zeros((EMBED,), jnp.float32)
    return p


def _encode_prep(x_nchw, key):
    """Shared by the Pallas forward and the pure-JAX reference: channel-major
    im2col operand, lane tiling, and the host-side noise draws."""
    x_cm = jnp.transpose(x_nchw, (1, 0, 2, 3)).astype(jnp.bfloat16)  # (C, N, H, W)
    cols_t, (n, ho, wo) = im2col_3x3_cm(x_cm, stride=2)
    m = n * ho * wo
    tm, mp = _pick_m_tiling(m)
    if mp != m:
        cols_t = jnp.pad(cols_t, ((0, 0), (0, mp - m)))
    k_eps, k_e1 = jax.random.split(key)
    eps = jax.random.normal(k_eps, (EMBED, mp), jnp.float32)
    # Exp(1) draw clamped away from 0 so rsqrt stays finite (matches the old
    # host-side uniform minval clamp).
    e1 = jnp.maximum(jax.random.exponential(k_e1, (EMBED, mp), jnp.float32), 1e-7)
    return cols_t, eps, e1, (n, ho, wo, m, tm, mp)


# ----------------------------- forward ---------------------------------------
@jax.jit
def tvae_forward(params, x_nchw, key):
    """Returns (input, dec, mu, logvar, df) — all NCHW, matching TVAE.forward."""
    cols_t, eps, e1, (n, ho, wo, m, tm, mp) = _encode_prep(x_nchw, key)

    # ---- encode: one fused kernel (conv -> quant -> reparam -> post_quant) ----
    mu_cm, lv_cm, df_cm, pz_cm = fused_encode(cols_t, eps, e1, params, tm)

    def to_nchw(a_cm, c):   # channel-major (C, M) -> (N, C, Ho, Wo); major dims only
        return a_cm[:, :m].reshape(c, n, ho, wo).transpose(1, 0, 2, 3)

    mu = to_nchw(mu_cm, EMBED)
    logvar = to_nchw(lv_cm, EMBED)
    df = to_nchw(df_cm, EMBED)

    # ---- decode: nearest x2 upsample + 3x3 conv stand-in (channel-major) ----
    pz = pz_cm[:, :m].reshape(Z_CH, n, ho, wo)                 # already channel-major
    # TODO(synk): fold the upsample + im2col into the decoder kernel (halo-tile
    # reads of pz) for the real Decoder to avoid the HBM blow-up.
    up = jnp.repeat(jnp.repeat(pz, 2, axis=2), 2, axis=3).astype(jnp.bfloat16)
    cols2_t, (n2, ho2, wo2) = im2col_3x3_cm(up, stride=1)
    m2 = n2 * ho2 * wo2
    tm2, mp2 = _pick_m_tiling(m2)
    if mp2 != m2:
        cols2_t = jnp.pad(cols2_t, ((0, 0), (0, mp2 - m2)))
    dec_cm = conv_matmul_bias_t(params["dec_w"], params["dec_b"], cols2_t, tm2)
    dec = dec_cm[:, :m2].reshape(IN_CH, n2, ho2, wo2).transpose(1, 0, 2, 3)

    return x_nchw, dec, mu, logvar, df


@jax.jit
def tvae_forward_ref(params, x_nchw, key):
    """Pure-JAX reference with the same bf16 operand rounding, f32 math."""
    cols_t, eps, e1, (n, ho, wo, m, tm, mp) = _encode_prep(x_nchw, key)
    f32 = jnp.float32

    h = params["enc_w"].astype(f32) @ cols_t.astype(f32) + params["enc_b"]
    h_b = h.astype(jnp.bfloat16).astype(f32)
    q = params["quant_w"].astype(f32) @ h_b + params["quant_b"]
    mu, logvar, logdf = q[:EMBED], q[EMBED:2 * EMBED], q[2 * EMBED:3 * EMBED]
    df = jnp.clip(jnp.exp(logdf) + 2.1, 2.1, 50.0)
    scale = jnp.exp(0.5 * logvar)
    z = mu + scale * eps * df * jax.lax.rsqrt(e1)
    z_b = z.astype(jnp.bfloat16).astype(f32)
    pz = params["pq_w"].astype(f32) @ z_b + params["pq_b"]

    def to_nchw(a, c):
        return a[:, :m].reshape(c, n, ho, wo).transpose(1, 0, 2, 3)

    pz_cm = pz[:, :m].reshape(Z_CH, n, ho, wo)
    up = jnp.repeat(jnp.repeat(pz_cm, 2, axis=2), 2, axis=3).astype(jnp.bfloat16)
    cols2_t, (n2, ho2, wo2) = im2col_3x3_cm(up, stride=1)
    dec_cm = params["dec_w"].astype(f32) @ cols2_t.astype(f32) + params["dec_b"]
    dec = dec_cm.reshape(IN_CH, n2, ho2, wo2).transpose(1, 0, 2, 3)
    return x_nchw, dec, to_nchw(mu, EMBED), to_nchw(logvar, EMBED), to_nchw(df, EMBED)


# ----------------------------- main -------------------------------------------
if __name__ == "__main__":
    root = jax.random.PRNGKey(0)
    k_x, k_p, k_r = jax.random.split(root, 3)

    x = jax.random.normal(k_x, (BATCH, IN_CH, RES, RES), jnp.float32)
    params = init_params(k_p)

    inp, dec, mu, logvar, df = tvae_forward(params, x, k_r)
    jax.block_until_ready((inp, dec, mu, logvar, df))

    # --- shape / range / finiteness checks (TVAE.forward output contract) ---
    assert inp.shape == (BATCH, IN_CH, RES, RES)
    assert dec.shape == (BATCH, IN_CH, RES, RES)
    assert mu.shape == logvar.shape == df.shape == (BATCH, EMBED, RES // 2, RES // 2)
    assert bool(jnp.all(df >= 2.1 - 1e-5)) and bool(jnp.all(df <= 50.0 + 1e-5))
    for a in (dec, mu, logvar, df):
        assert bool(jnp.all(jnp.isfinite(a)))

    # --- pure-JAX reference, tolerance-asserted (not just finiteness) ---
    # dec gets a looser bound: the kernel and reference independently re-round
    # intermediates (h, z, upsampled pz) to bf16, and a ULP flip near a rounding
    # boundary propagates through the 36-tap decoder sum.
    _, r_dec, r_mu, r_lv, r_df = tvae_forward_ref(params, x, k_r)

    def rel_err(a, b):
        return float(jnp.max(jnp.abs(a - b)) / jnp.maximum(jnp.max(jnp.abs(b)), 1.0))

    assert rel_err(mu, r_mu) < 5e-2, f"mu mismatch: {rel_err(mu, r_mu)}"
    assert rel_err(logvar, r_lv) < 5e-2, f"logvar mismatch: {rel_err(logvar, r_lv)}"
    assert rel_err(df, r_df) < 5e-2, f"df mismatch: {rel_err(df, r_df)}"
    assert rel_err(dec, r_dec) < 2e-1, f"dec mismatch: {rel_err(dec, r_dec)}"

    print("KERNEL_OK")
</pallas_src>

<mosaic_0001>
module attributes {stable_mosaic.version = 11 : i64} {
  func.func @_encode_fused_kernel(%arg0: i32, %arg1: memref<32x128xbf16, #tpu.memory_space<vmem>>, %arg2: memref<8x32xbf16, #tpu.memory_space<vmem>>, %arg3: memref<8x1xf32, #tpu.memory_space<vmem>>, %arg4: memref<12x8xbf16, #tpu.memory_space<vmem>>, %arg5: memref<12x1xf32, #tpu.memory_space<vmem>>, %arg6: memref<4x4xbf16, #tpu.memory_space<vmem>>, %arg7: memref<4x1xf32, #tpu.memory_space<vmem>>, %arg8: memref<4x128xf32, #tpu.memory_space<vmem>>, %arg9: memref<4x128xf32, #tpu.memory_space<vmem>>, %arg10: memref<4x128xf32, #tpu.memory_space<vmem>>, %arg11: memref<4x128xf32, #tpu.memory_space<vmem>>, %arg12: memref<4x128xf32, #tpu.memory_space<vmem>>, %arg13: memref<4x128xf32, #tpu.memory_space<vmem>>) attributes {dimension_semantics = [#tpu.dimension_semantics<parallel>], iteration_bounds = array<i64: 2>, scalar_prefetch = 0 : i64, scratch_operands = 0 : i64, tpu.core_type = #tpu.core_type<tc>, window_params = [{transform_indices = @transform_0, window_bounds = array<i64: 32, 128>}, {pipeline_mode = #tpu.pipeline_mode<synchronous>, transform_indices = @transform_1, window_bounds = array<i64: 8, 32>}, {pipeline_mode = #tpu.pipeline_mode<synchronous>, transform_indices = @transform_2, window_bounds = array<i64: 8, 1>}, {pipeline_mode = #tpu.pipeline_mode<synchronous>, transform_indices = @transform_3, window_bounds = array<i64: 12, 8>}, {pipeline_mode = #tpu.pipeline_mode<synchronous>, transform_indices = @transform_4, window_bounds = array<i64: 12, 1>}, {pipeline_mode = #tpu.pipeline_mode<synchronous>, transform_indices = @transform_5, window_bounds = array<i64: 4, 4>}, {pipeline_mode = #tpu.pipeline_mode<synchronous>, transform_indices = @transform_6, window_bounds = array<i64: 4, 1>}, {transform_indices = @transform_7, window_bounds = array<i64: 4, 128>}, {transform_indices = @transform_8, window_bounds = array<i64: 4, 128>}, {transform_indices = @transform_9, window_bounds = array<i64: 4, 128>}, {transform_indices = @transform_10, window_bounds = array<i64: 4, 128>}, {transform_indices = @transform_11, window_bounds = array<i64: 4, 128>}, {transform_indices = @transform_12, window_bounds = array<i64: 4, 128>}]} {
    %c0 = arith.constant 0 : index
    %c0_0 = arith.constant 0 : index
    %0 = vector.load %arg2[%c0, %c0_0] : memref<8x32xbf16, #tpu.memory_space<vmem>>, vector<8x32xbf16>
    %c0_1 = arith.constant 0 : index
    %c0_2 = arith.constant 0 : index
    %1 = vector.load %arg1[%c0_1, %c0_2] : memref<32x128xbf16, #tpu.memory_space<vmem>>, vector<32x128xbf16>
    %cst = arith.constant dense<0.000000e+00> : vector<8x128xf32>
    %2 = tpu.matmul %0, %1, %cst {dimension_numbers = #tpu.dot_dimension_numbers<[1], [0], [0], [1], [0, 0, 1, 1], [], []>} : vector<8x32xbf16>, vector<32x128xbf16>, vector<8x128xf32> -> vector<8x128xf32>
    %c0_3 = arith.constant 0 : index
    %c0_4 = arith.constant 0 : index
    %3 = vector.load %arg3[%c0_3, %c0_4] : memref<8x1xf32, #tpu.memory_space<vmem>>, vector<8x1xf32>
    %4 = vector.broadcast %3 : vector<8x1xf32> to vector<8x128xf32>
    %5 = arith.addf %2, %4 : vector<8x128xf32>
    %c0_5 = arith.constant 0 : index
    %c0_6 = arith.constant 0 : index
    %6 = vector.load %arg4[%c0_5, %c0_6] : memref<12x8xbf16, #tpu.memory_space<vmem>>, vector<12x8xbf16>
    %7 = arith.truncf %5 : vector<8x128xf32> to vector<8x128xbf16>
    %cst_7 = arith.constant dense<0.000000e+00> : vector<12x128xf32>
    %8 = tpu.matmul %6, %7, %cst_7 {dimension_numbers = #tpu.dot_dimension_numbers<[1], [0], [0], [1], [0, 0, 1, 1], [], []>} : vector<12x8xbf16>, vector<8x128xbf16>, vector<12x128xf32> -> vector<12x128xf32>
    %c0_8 = arith.constant 0 : index
    %c0_9 = arith.constant 0 : index
    %9 = vector.load %arg5[%c0_8, %c0_9] : memref<12x1xf32, #tpu.memory_space<vmem>>, vector<12x1xf32>
    %10 = vector.broadcast %9 : vector<12x1xf32> to vector<12x128xf32>
    %11 = arith.addf %8, %10 : vector<12x128xf32>
    %12 = vector.extract_strided_slice %11 {offsets = [0, 0], sizes = [4, 128], strides = [1, 1]} : vector<12x128xf32> to vector<4x128xf32>
    %13 = vector.extract_strided_slice %11 {offsets = [4, 0], sizes = [4, 128], strides = [1, 1]} : vector<12x128xf32> to vector<4x128xf32>
    %14 = vector.extract_strided_slice %11 {offsets = [8, 0], sizes = [4, 128], strides = [1, 1]} : vector<12x128xf32> to vector<4x128xf32>
    %15 = math.exp %14 : vector<4x128xf32>
    %cst_10 = arith.constant 2.100000e+00 : f32
    %16 = vector.broadcast %cst_10 : f32 to vector<4x128xf32>
    %17 = arith.addf %15, %16 : vector<4x128xf32>
    %cst_11 = arith.constant 2.100000e+00 : f32
    %cst_12 = arith.constant 5.000000e+01 : f32
    %18 = vector.broadcast %cst_11 : f32 to vector<4x128xf32>
    %19 = arith.maximumf %18, %17 : vector<4x128xf32>
    %20 = vector.broadcast %cst_12 : f32 to vector<4x128xf32>
    %21 = arith.minimumf %20, %19 : vector<4x128xf32>
    %cst_13 = arith.constant 5.000000e-01 : f32
    %22 = vector.broadcast %cst_13 : f32 to vector<4x128xf32>
    %23 = arith.mulf %22, %13 : vector<4x128xf32>
    %24 = math.exp %23 : vector<4x128xf32>
    %c0_14 = arith.constant 0 : index
    %c0_15 = arith.constant 0 : index
    %25 = vector.load %arg8[%c0_14, %c0_15] : memref<4x128xf32, #tpu.memory_space<vmem>>, vector<4x128xf32>
    %26 = arith.mulf %24, %25 : vector<4x128xf32>
    %27 = arith.mulf %26, %21 : vector<4x128xf32>
    %c0_16 = arith.constant 0 : index
    %c0_17 = arith.constant 0 : index
    %28 = vector.load %arg9[%c0_16, %c0_17] : memref<4x128xf32, #tpu.memory_space<vmem>>, vector<4x128xf32>
    %29 = math.rsqrt %28 : vector<4x128xf32>
    %30 = arith.mulf %27, %29 : vector<4x128xf32>
    %31 = arith.addf %12, %30 : vector<4x128xf32>
    %c0_18 = arith.constant 0 : index
    %c0_19 = arith.constant 0 : index
    %32 = vector.load %arg6[%c0_18, %c0_19] : memref<4x4xbf16, #tpu.memory_space<vmem>>, vector<4x4xbf16>
    %33 = arith.truncf %31 : vector<4x128xf32> to vector<4x128xbf16>
    %cst_20 = arith.constant dense<0.000000e+00> : vector<4x128xf32>
    %34 = tpu.matmul %32, %33, %cst_20 {dimension_numbers = #tpu.dot_dimension_numbers<[1], [0], [0], [1], [0, 0, 1, 1], [], []>} : vector<4x4xbf16>, vector<4x128xbf16>, vector<4x128xf32> -> vector<4x128xf32>
    %c0_21 = arith.constant 0 : index
    %c0_22 = arith.constant 0 : index
    %35 = vector.load %arg7[%c0_21, %c0_22] : memref<4x1xf32, #tpu.memory_space<vmem>>, vector<4x1xf32>
    %36 = vector.broadcast %35 : vector<4x1xf32> to vector<4x128xf32>
    %37 = arith.addf %34, %36 : vector<4x128xf32>
    %c0_23 = arith.constant 0 : index
    %c0_24 = arith.constant 0 : index
    %38 = vector.load %arg10[%c0_23, %c0_24] : memref<4x128xf32, #tpu.memory_space<vmem>>, vector<4x128xf32>
    tpu.vector_store %arg10[%c0_23, %c0_24], %12 {strides = array<i32>} : memref<4x128xf32, #tpu.memory_space<vmem>>, vector<4x128xf32>,
    %c0_25 = arith.constant 0 : index
    %c0_26 = arith.constant 0 : index
    %39 = vector.load %arg11[%c0_25, %c0_26] : memref<4x128xf32, #tpu.memory_space<vmem>>, vector<4x128xf32>
    tpu.vector_store %arg11[%c0_25, %c0_26], %13 {strides = array<i32>} : memref<4x128xf32, #tpu.memory_space<vmem>>, vector<4x128xf32>,
    %c0_27 = arith.constant 0 : index
    %c0_28 = arith.constant 0 : index
    %40 = vector.load %arg12[%c0_27, %c0_28] : memref<4x128xf32, #tpu.memory_space<vmem>>, vector<4x128xf32>
    tpu.vector_store %arg12[%c0_27, %c0_28], %21 {strides = array<i32>} : memref<4x128xf32, #tpu.memory_space<vmem>>, vector<4x128xf32>,
    %c0_29 = arith.constant 0 : index
    %c0_30 = arith.constant 0 : index
    %41 = vector.load %arg13[%c0_29, %c0_30] : memref<4x128xf32, #tpu.memory_space<vmem>>, vector<4x128xf32>
    tpu.vector_store %arg13[%c0_29, %c0_30], %37 {strides = array<i32>} : memref<4x128xf32, #tpu.memory_space<vmem>>, vector<4x128xf32>,
    return
  }
  func.func @transform_0(%arg0: i32) -> (i32, i32) {
    %c0_i32 = arith.constant 0 : i32
    %c0_i32_0 = arith.constant 0 : i32
    return %c0_i32, %arg0 : i32, i32
  }
  func.func @transform_1(%arg0: i32) -> (i32, i32) {
    %c0_i32 = arith.constant 0 : i32
    %c0_i32_0 = arith.constant 0 : i32
    %c0_i32_1 = arith.constant 0 : i32
    return %c0_i32, %c0_i32_0 : i32, i32
  }
  func.func @transform_2(%arg0: i32) -> (i32, i32) {
    %c0_i32 = arith.constant 0 : i32
    %c0_i32_0 = arith.constant 0 : i32
    %c0_i32_1 = arith.constant 0 : i32
    return %c0_i32, %c0_i32_0 : i32, i32
  }
  func.func @transform_3(%arg0: i32) -> (i32, i32) {
    %c0_i32 = arith.constant 0 : i32
    %c0_i32_0 = arith.constant 0 : i32
    %c0_i32_1 = arith.constant 0 : i32
    return %c0_i32, %c0_i32_0 : i32, i32
  }
  func.func @transform_4(%arg0: i32) -> (i32, i32) {
    %c0_i32 = arith.constant 0 : i32
    %c0_i32_0 = arith.constant 0 : i32
    %c0_i32_1 = arith.constant 0 : i32
    return %c0_i32, %c0_i32_0 : i32, i32
  }
  func.func @transform_5(%arg0: i32) -> (i32, i32) {
    %c0_i32 = arith.constant 0 : i32
    %c0_i32_0 = arith.constant 0 : i32
    %c0_i32_1 = arith.constant 0 : i32
    return %c0_i32, %c0_i32_0 : i32, i32
  }
  func.func @transform_6(%arg0: i32) -> (i32, i32) {
    %c0_i32 = arith.constant 0 : i32
    %c0_i32_0 = arith.constant 0 : i32
    %c0_i32_1 = arith.constant 0 : i32
    return %c0_i32, %c0_i32_0 : i32, i32
  }
  func.func @transform_7(%arg0: i32) -> (i32, i32) {
    %c0_i32 = arith.constant 0 : i32
    %c0_i32_0 = arith.constant 0 : i32
    return %c0_i32, %arg0 : i32, i32
  }
  func.func @transform_8(%arg0: i32) -> (i32, i32) {
    %c0_i32 = arith.constant 0 : i32
    %c0_i32_0 = arith.constant 0 : i32
    return %c0_i32, %arg0 : i32, i32
  }
  func.func @transform_9(%arg0: i32) -> (i32, i32) {
    %c0_i32 = arith.constant 0 : i32
    %c0_i32_0 = arith.constant 0 : i32
    return %c0_i32, %arg0 : i32, i32
  }
  func.func @transform_10(%arg0: i32) -> (i32, i32) {
    %c0_i32 = arith.constant 0 : i32
    %c0_i32_0 = arith.constant 0 : i32
    return %c0_i32, %arg0 : i32, i32
  }
  func.func @transform_11(%arg0: i32) -> (i32, i32) {
    %c0_i32 = arith.constant 0 : i32
    %c0_i32_0 = arith.constant 0 : i32
    return %c0_i32, %arg0 : i32, i32
  }
  func.func @transform_12(%arg0: i32) -> (i32, i32) {
    %c0_i32 = arith.constant 0 : i32
    %c0_i32_0 = arith.constant 0 : i32
    return %c0_i32, %arg0 : i32, i32
  }
}

module attributes {stable_mosaic.version = 11 : i64} {
  func.func @_matmul_bias_kernel(%arg0: i32, %arg1: memref<3x48xbf16, #tpu.memory_space<vmem>>, %arg2: memref<48x256xbf16, #tpu.memory_space<vmem>>, %arg3: memref<3x1xf32, #tpu.memory_space<vmem>>, %arg4: memref<3x256xf32, #tpu.memory_space<vmem>>) attributes {dimension_semantics = [#tpu.dimension_semantics<parallel>], iteration_bounds = array<i64: 2>, scalar_prefetch = 0 : i64, scratch_operands = 0 : i64, tpu.core_type = #tpu.core_type<tc>, window_params = [{pipeline_mode = #tpu.pipeline_mode<synchronous>, transform_indices = @transform_0, window_bounds = array<i64: 3, 48>}, {transform_indices = @transform_1, window_bounds = array<i64: 48, 256>}, {pipeline_mode = #tpu.pipeline_mode<synchronous>, transform_indices = @transform_2, window_bounds = array<i64: 3, 1>}, {transform_indices = @transform_3, window_bounds = array<i64: 3, 256>}]} {
    %c0 = arith.constant 0 : index
    %c0_0 = arith.constant 0 : index
    %0 = vector.load %arg1[%c0, %c0_0] : memref<3x48xbf16, #tpu.memory_space<vmem>>, vector<3x48xbf16>
    %c0_1 = arith.constant 0 : index
    %c0_2 = arith.constant 0 : index
    %1 = vector.load %arg2[%c0_1, %c0_2] : memref<48x256xbf16, #tpu.memory_space<vmem>>, vector<48x256xbf16>
    %cst = arith.constant dense<0.000000e+00> : vector<3x256xf32>
    %2 = tpu.matmul %0, %1, %cst {dimension_numbers = #tpu.dot_dimension_numbers<[1], [0], [0], [1], [0, 0, 1, 1], [], []>} : vector<3x48xbf16>, vector<48x256xbf16>, vector<3x256xf32> -> vector<3x256xf32>
    %c0_3 = arith.constant 0 : index
    %c0_4 = arith.constant 0 : index
    %3 = vector.load %arg3[%c0_3, %c0_4] : memref<3x1xf32, #tpu.memory_space<vmem>>, vector<3x1xf32>
    %4 = vector.broadcast %3 : vector<3x1xf32> to vector<3x256xf32>
    %5 = arith.addf %2, %4 : vector<3x256xf32>
    %c0_5 = arith.constant 0 : index
    %c0_6 = arith.constant 0 : index
    %6 = vector.load %arg4[%c0_5, %c0_6] : memref<3x256xf32, #tpu.memory_space<vmem>>, vector<3x256xf32>
    tpu.vector_store %arg4[%c0_5, %c0_6], %5 {strides = array<i32>} : memref<3x256xf32, #tpu.memory_space<vmem>>, vector<3x256xf32>,
    return
  }
  func.func @transform_0(%arg0: i32) -> (i32, i32) {
    %c0_i32 = arith.constant 0 : i32
    %c0_i32_0 = arith.constant 0 : i32
    %c0_i32_1 = arith.constant 0 : i32
    return %c0_i32, %c0_i32_0 : i32, i32
  }
  func.func @transform_1(%arg0: i32) -> (i32, i32) {
    %c0_i32 = arith.constant 0 : i32
    %c0_i32_0 = arith.constant 0 : i32
    return %c0_i32, %arg0 : i32, i32
  }
  func.func @transform_2(%arg0: i32) -> (i32, i32) {
    %c0_i32 = arith.constant 0 : i32
    %c0_i32_0 = arith.constant 0 : i32
    %c0_i32_1 = arith.constant 0 : i32
    return %c0_i32, %c0_i32_0 : i32, i32
  }
  func.func @transform_3(%arg0: i32) -> (i32, i32) {
    %c0_i32 = arith.constant 0 : i32
    %c0_i32_0 = arith.constant 0 : i32
    return %c0_i32, %arg0 : i32, i32
  }
}

</mosaic_0001>

<bundles_post_ra>
// kernel: tvae_forward.2
= control target key start
LH: loop header
LB: loop body
LE: loop exit
PB: predicated region body
PF: predicated region fallthrough
CT: control target
= control target key end

     0   :  { %s1109_s21 = smov 0   ;;  %s1111_s22 = smov 0   ;;  %s1210_s0 = inlined_call_operand.vmem [shape: bf16[32,256], index: 0, kind: input, shape index: {}]   ;;  %s1211_s1 = inlined_call_operand.vmem [shape: bf16[8,32], index: 1, kind: input, shape index: {}]   ;;  %s1212_s2 = inlined_call_operand.vmem [shape: f32[8,1], index: 2, kind: input, shape index: {}]   ;;  %s1213_s3 = inlined_call_operand.vmem [shape: bf16[12,8], index: 3, kind: input, shape index: {}]   ;;  %s1214_s4 = inlined_call_operand.vmem [shape: f32[12,1], index: 4, kind: input, shape index: {}]   ;;  %s1215_s5 = inlined_call_operand.vmem [shape: bf16[4,4], index: 5, kind: input, shape index: {}]   ;;  %s1216_s6 = inlined_call_operand.vmem [shape: f32[4,1], index: 6, kind: input, shape index: {}]   ;;  %s1217_s7 = inlined_call_operand.vmem [shape: f32[4,256], index: 7, kind: input, shape index: {}]   ;;  %s1218_s8 = inlined_call_operand.vmem [shape: f32[4,256], index: 8, kind: input, shape index: {}]   ;;  %s1219_s9 = inlined_call_operand.vmem [shape: f32[4,256], index: 9, kind: output, shape index: {0}]   ;;  %s1220_s10 = inlined_call_operand.vmem [shape: f32[4,256], index: 10, kind: output, shape index: {1}]   ;;  %s1221_s11 = inlined_call_operand.vmem [shape: f32[4,256], index: 11, kind: output, shape index: {2}]   ;;  %s1222_s12 = inlined_call_operand.vmem [shape: f32[4,256], index: 12, kind: output, shape index: {3}]  }
   0x1   :  { %s1113_s23 = smov 0  }
   0x2 LB: > { %s930_s24 = sadd.s32 4294967295, %s1039_s23   ;;  %s1126_s25 = sadd.s32 1, %s1039_s23   ;;  %s1039_s23 = sphi %s1113_s23, %s1225_s23   ;;  %s1035_s22 = sphi %s1111_s22, %s1224_s22   ;;  %s1031_s21 = sphi %s1109_s21, %s1223_s21  }
   0x3   : > { %s27_s26 = ssub.s32 %s1039_s23, %s1126_s25  ;;  %s30_s27 = sadd.s32 1, %s1035_s22 }
   0x4   : > { %p28_p0 = scmp.eq.s32.totalorder %s27_s26, 0  ;;  %p37_p1 = scmp.ne.s32.totalorder %s1035_s22, %s1031_s21 }
   0x5   : > { %p38_p2 = scmp.eq.s32.totalorder %s1039_s23, 0  ;;  %p933_p4 = scmp.ge.s32.totalorder %s1039_s23, 2 }
   0x6   : > { %s1135_s28 = scalar_select %p28_p0, %s1035_s22, %s30_s27  }
   0x7   : > { %p39_p3 = por %p38_p2, %p37_p1  ;;  %363 = sbr.rel (%p933_p4) target bundleno = 21 (0x15), region = 40 }
   0xe   : > { %366 = sbr.rel (!%p39_p3) target bundleno = 21 (0x15), region = 44  ;;  %s368_s29 = sand.u32 (%p39_p3), 1, %s1035_s22  }
   0xf   : > { %s935_s30 = sshll.u32 (%p39_p3), %s1039_s23, 2  ;;  %s934_s13 = sshll.u32 (%p39_p3), %s368_s29, 4 }
  0x10   : > { %s372_s16 = scalar_lea.vmem (%p39_p3), %s1210_s0, %s935_s30  ;;  %s370_s17 = scalar_lea.vmem (%p39_p3), [#allocation2], %s934_s13 }
  0x11   : > { %v388_v0 = vld [vmem:[%s372_s16] sm:$0xf] (%p39_p3)  ;;  %v390_v1 = vld [vmem:[%s372_s16 + $0x8] sm:$0xf] (%p39_p3)  ;;  %v392_v2 = vld [vmem:[%s372_s16 + $0x10] sm:$0xf] (%p39_p3) }
  0x12   : > { %389 = vst [vmem:[%s370_s17] sm:$0xf] (%p39_p3), %v388_v0  ;;  %391 = vst [vmem:[%s370_s17 + $0x4] sm:$0xf] (%p39_p3), %v390_v1  ;;  %v394_v3 = vld [vmem:[%s372_s16 + $0x18] sm:$0xf] (%p39_p3) }
  0x13   : > { %393 = vst [vmem:[%s370_s17 + $0x8] sm:$0xf] (%p39_p3), %v392_v2  ;;  %395 = vst [vmem:[%s370_s17 + $0xc] sm:$0xf] (%p39_p3), %v394_v3 }
  0x15 PF: > { %p936_p5 = scmp.ge.s32.totalorder %s1039_s23, 1  ;;  %p439_p6 = scmp.lt.s32.totalorder %s1039_s23, 3 }
  0x17   : > { %p440_p7 = pnand %p936_p5, %p439_p6 }
  0x18   : > { %s446_s18 = sand.u32 (!%p440_p7), 1, %s1031_s21   ;;  %v1041_v4 = vmov (!%p440_p7), 0.0   ;;  %vm1042_vm0 = vmmov (!%p440_p7), 0   ;;  %v536_v5 = vld [vmem:[%s1212_s2] sm:$0xff] (!%p440_p7)  ;;  %v1043_v6 = vmov (!%p440_p7), 0   ;;  %vm554_vm1 = vcmask (!%p440_p7), 261120  }
  0x19   : > { %443 = sbr.rel (%p440_p7) target bundleno = 721 (0x2d1), region = 93  ;;  %959 = vmatprep.subr.bf16.mxu0 (!%p440_p7), %v1041_v4  ;;  %s937_s19 = sshll.u32 (!%p440_p7), %s446_s18, 4  ;;  %963 = vmatprep.mubr.msk.bf16.mxu0 (!%p440_p7), %vm1042_vm0, %v1041_v4  ;;  %v602_v8 = vld [vmem:[%s1214_s4 + $0x8] sm:$0xf] (!%p440_p7)  ;;  %v531_v10 = vld [vmem:[%s1211_s1] sm:$0xf] (!%p440_p7) }
  0x1a   : > { %1006 = vset.pattern.permute.xlu0 (!%p440_p7), %v1043_v6  ;;  %967 = vmatprep.subr.bf16.mxu1 (!%p440_p7), %v1041_v4  ;;  %s448_s27 = scalar_lea.vmem (!%p440_p7), [#allocation2], %s937_s19  ;;  %v601_v11 = vld [vmem:[%s1214_s4] sm:$0xff] (!%p440_p7)  ;;  %vm622_vm2 = vcmask (!%p440_p7), 1043456   ;;  %vm618_vm3 = vcmask (!%p440_p7), 64512   ;;  %p506_p8 = scmp.lt.s32.totalorder (!%p440_p7), %s930_s24, 1  ;;  %vm706_vm4 = vcmask (!%p440_p7), 1041408  }
  0x1b   : > { %v1008_v7 = vld [vmem:[%s448_s27] sm:$0xff] (!%p440_p7)   ;;  %539 = vperm.xlu0 (!%p440_p7), %1006, %v536_v5   ;;  %969 = vmatprep.mubr.msk.bf16.mxu1 (!%p440_p7), %vm1042_vm0, %v1041_v4  ;;  %v1009_v9 = vld [vmem:[%s448_s27 + $0x8] sm:$0xff] (!%p440_p7)   ;;  %vm702_vm5 = vcmask (!%p440_p7), 31744  }
  0x1c   : > { %1007 = vset.pattern.permute.xlu1 (!%p440_p7), %v1043_v6  ;;  %960 = vmatpush3.bf16.msra.mxu0 (!%p440_p7), %v1008_v7  ;;  %v696_v12 = vld [vmem:[%s1216_s6] sm:$0xf] (!%p440_p7) }
  0x1d   : > { %961 = vmatprep.subr.bf16.mxu0 (!%p440_p7), %v1041_v4  ;;  %605 = vperm.xlu1 (!%p440_p7), %1007, %v601_v11   ;;  %v1010_v21 = vld [vmem:[%s1213_s3] sm:$0x3f] (!%p440_p7)  }
  0x1e   : > { %v694_v51 = vld [vmem:[%s1215_s5] sm:$0x3] (!%p440_p7) }
  0x1f   : > { %610 = vperm.xlu0 (!%p440_p7), %1006, %v602_v8  }
  0x20   : > { %962 = vmatpush3.bf16.msra.mxu0 %v1009_v9  ;;  %s1227_s24 = smov (!%p506_p8, %s930_s24), 1 }
  0x21   : > { %699 = vperm.xlu1 %1007, %v696_v12   ;;  %s1171_s20 = sshll.u32 %s1227_s24, 2 }
  0x22   : > { %s517_s29 = scalar_lea.vmem %s1219_s9, %s1171_s20  ;;  %s521_s13 = scalar_lea.vmem %s1220_s10, %s1171_s20 }
  0x23   : > { %964 = vmatmul.mubr.msk.bf16.vlgmr.msra.gmra.mrb[0].mxu0 %vm554_vm1, %v531_v10  ;;  %s513_s14 = scalar_lea.vmem %s1218_s8, %s1171_s20  ;;  %s509_s17 = scalar_lea.vmem %s1217_s7, %s1171_s20 }
  0x24   : > { %v684_v33 = vld [vmem:[%s513_s14] sm:$0xf]  ;;  %s525_s26 = scalar_lea.vmem %s1221_s11, %s1171_s20 }
  0x25   : > { %v675_v35 = vld [vmem:[%s509_s17] sm:$0xf] }
  0x26   : > { %v677_v39 = vrot.slane %v675_v35, 4 }
  0x9a   : > { %v540_v13 = vpop.permute.xlu0 %539 }
  0x9c   : > { %v606_v22 = vpop.permute.xlu1 %605 }
  0x9e   : > { %v611_v26 = vpop.permute.xlu0 %610 }
  0xa0   : > { %v700_v52 = vpop.permute.xlu1 %699 }
  0xf6   : > { %v592_v14 = vpop.f32.mrb[0].mxu0 }
  0xf7   : > { %v593_v15 = vadd.f32 %v592_v14, %v540_v13  ;;  %v965_v16 = vpop.f32.mrb[1].mxu0 }
  0xf8   : > { %v595_v17 = vpop.f32.mrb[2].mxu0 }
  0xf9   : > { %v600_v18 = vpack.c.bf16 %v593_v15, %v593_v15  ;;  %v966_v19 = vpop.f32.mrb[3].mxu0 }
  0xfb   : > { %v624_v20 = vsel %vm622_vm2, %v600_v18, 0 }
  0xfc   : > { %968 = vmatpush3.bf16.msra.mxu1 %v624_v20 }
  0xfd   : > { %973 = vmatprep.subr.bf16.mxu1 %v1041_v4 }
  0xff   : > { %970 = vmatmul.mubr.msk.bf16.vlgmr.msra.gmra.mrb[0].mxu1 %vm618_vm3, %v1010_v21 }
 0x100   : > { %975 = vmatprep.mubr.msk.bf16.mxu1 %vm1042_vm0, %v1041_v4 }
 0x1d2   : > { %v660_v23 = vpop.f32.mrb[0].mxu1 }
 0x1d3   : > { %v661_v24 = vadd.f32 %v660_v23, %v606_v22  ;;  %v971_v25 = vpop.f32.mrb[1].mxu1 }
 0x1d4   : > { %v663_v27 = vpop.f32.mrb[2].mxu1 }
 0x1d5   : > { %750 = vst [vmem:[%s517_s29] sm:$0xf] %v661_v24  ;;  %751 = vst [vmem:[%s521_s13 - $0x4] sm:$0xf0] %v661_v24  ;;  %v664_v28 = vadd.f32 %v663_v27, %v611_v26  ;;  %v972_v29 = vpop.f32.mrb[3].mxu1  ;;  %v672_v30 = vmul.f32 0.5, %v661_v24  ;;  %s529_s13 = scalar_lea.vmem %s1222_s12, %s1171_s20 }
 0x1d7   : > { %v667_v31 = vmul.f32 1.442695, %v664_v28  ;;  %v673_v32 = vmul.f32 1.442695, %v672_v30 }
 0x1d9   : > { %1011 = vpow2.f32 %v667_v31 }
 0x1da   : > { %1013 = vrsqrt.f32 %v684_v33 }
 0x1db   : > { %1015 = vpow2.f32 %v673_v32 }
 0x1e3   : > { %v1012_v34 = vpop.eup %1011 }
 0x1e4   : > { %v669_v36 = vadd.f32 2.1, %v1012_v34  ;;  %v1014_v37 = vpop.eup %1013 }
 0x1e5   : > { %v1016_v40 = vpop.eup %1015  ;;  %v687_v44 = vrot.slane %v1014_v37, 4 }
 0x1e6   : > { %v670_v38 = vmax.f32 %v669_v36, 2.1  ;;  %v679_v42 = vmul.f32 %v1016_v40, %v677_v39 }
 0x1e8   : > { %v671_v41 = vmin.f32 %v670_v38, 50.0 }
 0x1ea   : > { %v681_v43 = vrot.slane %v671_v41, 4  ;;  %752 = vst [vmem:[%s525_s26] sm:$0xf] %v671_v41 }
 0x1ec   : > { %v683_v45 = vmul.f32 %v681_v43, %v679_v42 }
 0x1ee   : > { %v689_v46 = vmul.f32 %v687_v44, %v683_v45 }
 0x1f0   : > { %v691_v47 = vrot.slane %v689_v46, 4 }
 0x1f2   : > { %v693_v48 = vadd.f32 %v691_v47, %v661_v24 }
 0x1f4   : > { %v695_v49 = vpack.c.bf16 %v693_v48, %v693_v48 }
 0x1f6   : > { %v708_v50 = vsel %vm706_vm4, %v695_v49, 0 }
 0x1f7   : > { %974 = vmatpush3.bf16.msra.mxu1 %v708_v50 }
 0x1fa   : > { %976 = vmatmul.mubr.msk.bf16.vlgmr.msra.gmra.mrb[4].mxu1 %vm702_vm5, %v694_v51 }
 0x2cd   : > { %v744_v53 = vpop.f32.mrb[4].mxu1 }
 0x2ce   : > { %v745_v54 = vadd.f32 %v744_v53, %v700_v52  ;;  %v977_v55 = vpop.f32.mrb[5].mxu1 }
 0x2cf   : > { %v747_v56 = vpop.f32.mrb[6].mxu1 }
 0x2d0   : > { %753 = vst [vmem:[%s529_s13] sm:$0xf] %v745_v54  ;;  %v978_v57 = vpop.f32.mrb[7].mxu1 }
 0x2d1 PF: > { %p20_p9 = scmp.ge.s32.totalorder %s1126_s25, 4   ;;  %s1223_s21 = smov %s1035_s22 }
 0x2d2   : > { %s1224_s22 = smov %s1135_s28  ;;  %s1225_s23 = smov %s1126_s25 }
 0x2d3   :  { %22 = sbr.rel (!%p20_p9) target bundleno = 2 (0x2), region = 174 }

// kernel: tvae_forward.3
= control target key start
LH: loop header
LB: loop body
LE: loop exit
PB: predicated region body
PF: predicated region fallthrough
CT: control target
= control target key end

     0   :  { %s485_s12 = smov 0   ;;  %s487_s13 = smov 0   ;;  %s543_s0 = inlined_call_operand.vmem [shape: bf16[3,48], index: 0, kind: input, shape index: {}]   ;;  %s544_s1 = inlined_call_operand.vmem [shape: bf16[48,512], index: 1, kind: input, shape index: {}]   ;;  %s545_s2 = inlined_call_operand.vmem [shape: f32[3,1], index: 2, kind: input, shape index: {}]   ;;  %s546_s3 = inlined_call_operand.vmem [shape: f32[3,512], index: 3, kind: output, shape index: {}]  }
   0x1   :  { %s489_s14 = smov 0  }
   0x2 LB: > { %s384_s15 = sadd.s32 4294967295, %s462_s14   ;;  %s502_s16 = sadd.s32 1, %s462_s14   ;;  %s462_s14 = sphi %s489_s14, %s549_s14   ;;  %s458_s13 = sphi %s487_s13, %s548_s13   ;;  %s454_s12 = sphi %s485_s12, %s547_s12  }
   0x3   : > { %s38_s17 = ssub.s32 %s462_s14, %s502_s16  ;;  %s41_s18 = sadd.s32 1, %s458_s13 }
   0x4   : > { %p39_p0 = scmp.eq.s32.totalorder %s38_s17, 0  ;;  %p48_p1 = scmp.ne.s32.totalorder %s458_s13, %s454_s12 }
   0x5   : > { %p49_p2 = scmp.eq.s32.totalorder %s462_s14, 0  ;;  %p387_p4 = scmp.ge.s32.totalorder %s462_s14, 2 }
   0x6   : > { %s511_s19 = scalar_select %p39_p0, %s458_s13, %s41_s18  }
   0x7   : > { %p50_p3 = por %p49_p2, %p48_p1  ;;  %127 = sbr.rel (%p387_p4) target bundleno = 21 (0x15), region = 24 }
   0xe   : > { %130 = sbr.rel (!%p50_p3) target bundleno = 21 (0x15), region = 28  ;;  %s132_s20 = sand.u32 (%p50_p3), 1, %s458_s13  }
   0xf   : > { %s402_s21 = sshll.u32 (%p50_p3), %s462_s14, 3  ;;  %s403_s22 = smul.u32 (%p50_p3), 48, %s132_s20 }
  0x10   : > { %s137_s25 = scalar_lea.vmem (%p50_p3), %s544_s1, %s402_s21 }
  0x11   : > { %v175_v0 = vld [vmem:[%s137_s25] sm:$0xff] (%p50_p3)  ;;  %v177_v1 = vld [vmem:[%s137_s25 + $0x10] sm:$0xff] (%p50_p3)  ;;  %s134_s26 = scalar_lea.vmem (%p50_p3), [#allocation2], %s403_s22 }
  0x12   : > { %v179_v2 = vld [vmem:[%s137_s25 + $0x20] sm:$0xff] (%p50_p3)  ;;  %v181_v3 = vld [vmem:[%s137_s25 + $0x30] sm:$0xff] (%p50_p3)  ;;  %176 = vst [vmem:[%s134_s26] sm:$0xff] (%p50_p3), %v175_v0  ;;  %178 = vst [vmem:[%s134_s26 + $0x8] sm:$0xff] (%p50_p3), %v177_v1 }
  0x13   : > { %v183_v4 = vld [vmem:[%s137_s25 + $0x40] sm:$0xff] (%p50_p3)  ;;  %v185_v5 = vld [vmem:[%s137_s25 + $0x50] sm:$0xff] (%p50_p3)  ;;  %180 = vst [vmem:[%s134_s26 + $0x10] sm:$0xff] (%p50_p3), %v179_v2  ;;  %182 = vst [vmem:[%s134_s26 + $0x18] sm:$0xff] (%p50_p3), %v181_v3 }
  0x14   : > { %184 = vst [vmem:[%s134_s26 + $0x20] sm:$0xff] (%p50_p3), %v183_v4  ;;  %186 = vst [vmem:[%s134_s26 + $0x28] sm:$0xff] (%p50_p3), %v185_v5 }
  0x15 PF: > { %p390_p5 = scmp.ge.s32.totalorder %s462_s14, 1  ;;  %p191_p6 = scmp.lt.s32.totalorder %s462_s14, 3 }
  0x17   : > { %p192_p7 = pnand %p390_p5, %p191_p6 }
  0x18   : > { %s198_s27 = sand.u32 (!%p192_p7), 1, %s454_s12   ;;  %v464_v6 = vmov (!%p192_p7), 0   ;;  %v236_v7 = vld [vmem:[%s545_s2] sm:$0x7] (!%p192_p7)  ;;  %vm272_vm0 = vcmask (!%p192_p7), 392192   ;;  %s391_s7 = sshll.u32 (!%p192_p7), %s384_s15, 1 }
  0x19   : > { %195 = sbr.rel (%p192_p7) target bundleno = 260 (0x104), region = 66  ;;  %308 = vmatprep.mubr.bf16.mxu0 (!%p192_p7), %v464_v6  ;;  %430 = vset.pattern.permute.xlu0 (!%p192_p7), %v464_v6  ;;  %v229_v14 = vld [vmem:[%s543_s0] sm:$0x3] (!%p192_p7)  ;;  %p223_p8 = scmp.lt.s32.totalorder (!%p192_p7), %s391_s7, 3 }
  0x1a   : > { %s404_s28 = smul.u32 (!%p192_p7), 48, %s198_s27  ;;  %239 = vperm.xlu0 (!%p192_p7), %430, %v236_v7  }
  0x1c   : > { %s200_s4 = scalar_lea.vmem (!%p192_p7), [#allocation2], %s404_s28 }
  0x1d   : > { %v431_v8 = vld [vmem:[%s200_s4 + $0x4] ss:$8 sps:$4 sm:$0xff] (!%p192_p7)   ;;  %v433_v9 = vld [vmem:[%s200_s4] ss:$8 sps:$4 sm:$0xff] (!%p192_p7)   ;;  %v434_v10 = vld [vmem:[%s200_s4 + $0x14] ss:$8 sps:$4 sm:$0xff] (!%p192_p7)  }
  0x1e   : > { %276 = vmatprep.subr.bf16.mxu0 (!%p192_p7), %v431_v8  ;;  %v436_v11 = vld [vmem:[%s200_s4 + $0x10] ss:$8 sps:$4 sm:$0xff] (!%p192_p7)   ;;  %v437_v12 = vld [vmem:[%s200_s4 + $0x24] ss:$8 sps:$4 sm:$0xff] (!%p192_p7)   ;;  %v439_v13 = vld [vmem:[%s200_s4 + $0x20] ss:$8 sps:$4 sm:$0xff] (!%p192_p7)  }
  0x1f   : > { %277 = vmatpush1.bf16.msra.mxu0 (!%p192_p7), %v433_v9 }
  0x20   : > { %278 = vmatprep.subr.bf16.mxu0 %v434_v10  ;;  %s551_s7 = smov (!%p223_p8, %s391_s7), 3 }
  0x21   : > { %s392_s8 = sshll.u32 %s551_s7, 2 }
  0x22   : > { %s226_s11 = scalar_lea.vmem %s546_s3, %s392_s8 }
  0x23   : > { %279 = vmatpush1.bf16.msra.mxu0 %v436_v11 }
  0x24   : > { %280 = vmatprep.subr.bf16.mxu0 %v437_v12 }
  0x27   : > { %281 = vmatpush1.bf16.msra.mxu0 %v439_v13 }
  0x2a   : > { %399 = vmatmul.mubr.msk.bf16.vlgmr.msra.gmra.mrb[0].mxu0 %vm272_vm0, %v229_v14 }
  0x99   : > { %v240_v15 = vpop.permute.xlu0 %239 }
  0xfd   : > { %v310_v16 = vpop.f32.mrb[0].mxu0 }
  0xfe   : > { %v311_v17 = vadd.f32 %v310_v16, %v240_v15  ;;  %v312_v18 = vpop.f32.mrb[1].mxu0 }
  0xff   : > { %v313_v19 = vadd.f32 %v312_v18, %v240_v15  ;;  %v314_v20 = vpop.f32.mrb[2].mxu0 }
 0x100   : > { %v315_v21 = vpop.f32.mrb[3].mxu0 }
 0x101   : > { %v319_v22 = vcombine.low %v311_v17, %v313_v19 }
 0x103   : > { %321 = vst [vmem:[%s226_s11] sm:$0x77] %v319_v22 }
 0x104 PF: > { %p10_p9 = scmp.ge.s32.totalorder %s502_s16, 4   ;;  %s547_s12 = smov %s458_s13 }
 0x105   : > { %s548_s13 = smov %s511_s19  ;;  %s549_s14 = smov %s502_s16 }
 0x106   :  { %12 = sbr.rel (!%p10_p9) target bundleno = 2 (0x2), region = 105 }

</bundles_post_ra>
